<compile_context>
chip_gen: v7x
topology: tpu7x:2x2x1
jax: 0.10.0
libtpu: 0.0.40
codegen_flags: <defaults>
</compile_context>

<pallas_src>
import functools

import jax
import jax.numpy as jnp
from jax import lax
from jax.experimental import pallas as pl
from jax.experimental.pallas import tpu as pltpu

LANE = 128


def _round_up(v, m):
    return (v + m - 1) // m * m


def _gin_layer_kernel(adj_ref, x_ref, w_ref, b_ref, scale_ref, shift_ref,
                      o_ref, acc_ref, *, bn_relu, log_softmax, valid_out):
    k = pl.program_id(1)

    @pl.when(k == 0)
    def _():
        acc_ref[...] = jnp.zeros_like(acc_ref)

    # GINConv aggregation: adj_hat @ x  (self term already folded into adj_hat).
    # adj_hat arrives as bf16 (exact 0/1 values); accumulate in f32.
    acc_ref[...] += jnp.dot(adj_ref[...].astype(jnp.float32), x_ref[...],
                            preferred_element_type=jnp.float32)

    @pl.when(k == pl.num_programs(1) - 1)
    def _():
        h = acc_ref[...]
        # GINConv nn: Linear (weights zero-padded to lane width).
        y = jnp.dot(h, w_ref[...], preferred_element_type=jnp.float32)
        y = y + b_ref[...]
        if bn_relu:
            # BatchNorm1d (inference, folded into scale/shift) + ReLU.
            y = y * scale_ref[...] + shift_ref[...]
            y = jnp.maximum(y, 0.0)
        if log_softmax:
            # Mask padded logit columns so they don't perturb the logsumexp.
            col = lax.broadcasted_iota(jnp.int32, y.shape, 1)
            y = jnp.where(col < valid_out, y, -jnp.inf)
            m = jnp.max(y, axis=-1, keepdims=True)
            lse = m + jnp.log(jnp.sum(jnp.exp(y - m), axis=-1, keepdims=True))
            y = y - lse
        o_ref[...] = y.astype(o_ref.dtype)


def gin_layer(adj_bf16, x, w, b, scale, shift, *, bn_relu, log_softmax,
              valid_out, tm, tk):
    n_pad, c_in = x.shape
    c_out = w.shape[1]
    grid = (n_pad // tm, n_pad // tk)

    kernel = functools.partial(_gin_layer_kernel, bn_relu=bn_relu,
                               log_softmax=log_softmax, valid_out=valid_out)

    flops = 2 * n_pad * n_pad * c_in + 2 * n_pad * c_in * c_out
    bytes_accessed = (adj_bf16.size * 2            # bf16 adjacency stream
                      + x.size * 4 * grid[0]       # x re-streamed per row tile
                      + n_pad * c_out * 4          # output
                      + (w.size + 3 * c_out) * 4)  # resident params

    return pl.pallas_call(
        kernel,
        out_shape=jax.ShapeDtypeStruct((n_pad, c_out), jnp.float32),
        grid_spec=pltpu.PrefetchScalarGridSpec(
            num_scalar_prefetch=0,
            grid=grid,
            in_specs=[
                pl.BlockSpec((tm, tk), lambda i, k: (i, k)),      # adj tile
                pl.BlockSpec((tk, c_in), lambda i, k: (k, 0)),    # x tile
                pl.BlockSpec((c_in, c_out), lambda i, k: (0, 0)), # W (resident)
                pl.BlockSpec((1, c_out), lambda i, k: (0, 0)),    # bias
                pl.BlockSpec((1, c_out), lambda i, k: (0, 0)),    # BN scale
                pl.BlockSpec((1, c_out), lambda i, k: (0, 0)),    # BN shift
            ],
            out_specs=pl.BlockSpec((tm, c_out), lambda i, k: (i, 0)),
            scratch_shapes=[pltpu.VMEM((tm, c_in), jnp.float32)],
        ),
        compiler_params=pltpu.CompilerParams(
            dimension_semantics=("parallel", "arbitrary")),
        cost_estimate=pl.CostEstimate(
            flops=flops,
            transcendentals=n_pad * c_out if log_softmax else 0,
            bytes_accessed=bytes_accessed),
    )(adj_bf16, x, w, b, scale, shift)


def init_gin_params(key, in_channels, hidden_channels, out_channels, num_layers):
    """Deterministic parameter init mirroring torch.nn.Linear / BatchNorm1d defaults."""
    dims = [in_channels] + [hidden_channels] * (num_layers - 1) + [out_channels]
    linears = []
    for i in range(num_layers):
        key, kw, kb = jax.random.split(key, 3)
        bound = 1.0 / (dims[i] ** 0.5)
        w = jax.random.uniform(kw, (dims[i], dims[i + 1]), jnp.float32, -bound, bound)
        b = jax.random.uniform(kb, (1, dims[i + 1]), jnp.float32, -bound, bound)
        linears.append((w, b))
    # BatchNorm1d defaults: gamma=1, beta=0, running_mean=0, running_var=1.
    # Fold into an affine scale/shift for inference.
    bn_eps = 1e-5
    bns = []
    for _ in range(num_layers - 1):
        gamma = jnp.ones((1, hidden_channels), jnp.float32)
        beta = jnp.zeros((1, hidden_channels), jnp.float32)
        mean = jnp.zeros((1, hidden_channels), jnp.float32)
        var = jnp.ones((1, hidden_channels), jnp.float32)
        s = gamma / jnp.sqrt(var + bn_eps)
        sh = beta - mean * s
        bns.append((s, sh))
    return linears, bns


def _choose_tiles(n):
    """Row/contraction tile sizes and padded node count.

    Small graphs: one lane-aligned tile.  Large graphs: (256, 512) tiles
    (fits comfortably in v7x's smaller scoped VMEM with double buffering,
    and is >=512 on the streamed dimension to hide per-step overhead)."""
    n128 = _round_up(max(n, 1), LANE)
    if n128 <= 512:
        return n128, n128, n128
    tm, tk = 256, 512
    return tm, tk, _round_up(n, 512)


def gin_forward(x, adj, linears, bns, *, eps=0.0):
    n, c_in = x.shape
    num_layers = len(linears)
    out_c = linears[-1][0].shape[1]

    tm, tk, n_pad = _choose_tiles(n)

    # Fold (1 + eps) * x self term into the adjacency diagonal; pad nodes;
    # stream as bf16 (0/1 and 1+eps=1 for eps=0 are exact in bf16).
    adj_hat = adj + (1.0 + eps) * jnp.eye(n, dtype=adj.dtype)
    adj_hat = (jnp.zeros((n_pad, n_pad), jnp.bfloat16)
               .at[:n, :n].set(adj_hat.astype(jnp.bfloat16)))

    # Pad node features to lane-width channels and padded node count.
    c_in_pad = _round_up(c_in, LANE)
    xp = jnp.zeros((n_pad, c_in_pad), jnp.float32).at[:n, :c_in].set(x)

    for i in range(num_layers):
        w, b = linears[i]
        ci, co = w.shape
        ci_pad = _round_up(ci, LANE)
        co_pad = _round_up(co, LANE)
        wp = jnp.zeros((ci_pad, co_pad), jnp.float32).at[:ci, :co].set(w)
        bp = jnp.zeros((1, co_pad), jnp.float32).at[:, :co].set(b)
        last = (i == num_layers - 1)
        if not last:
            s, sh = bns[i]
            sp = jnp.zeros((1, co_pad), jnp.float32).at[:, :co].set(s)
            shp = jnp.zeros((1, co_pad), jnp.float32).at[:, :co].set(sh)
        else:
            sp = jnp.zeros((1, co_pad), jnp.float32)
            shp = jnp.zeros((1, co_pad), jnp.float32)
        xp = gin_layer(adj_hat, xp, wp, bp, sp, shp,
                       bn_relu=not last, log_softmax=last,
                       valid_out=co, tm=tm, tk=tk)
        # F.dropout(training=False) -> identity at inference.

    return xp[:n, :out_c]


def gin_forward_ref(x, adj, linears, bns):
    """Pure-JAX f32 reference for correctness checking."""
    num_layers = len(linears)
    for i in range(num_layers - 1):
        w, b = linears[i]
        s, sh = bns[i]
        h = adj @ x + x
        y = h @ w + b
        x = jnp.maximum(y * s + sh, 0.0)
    w, b = linears[-1]
    h = adj @ x + x
    y = h @ w + b
    return jax.nn.log_softmax(y, axis=-1)


if __name__ == "__main__":
    key = jax.random.PRNGKey(0)

    # Small synthetic graph: 16 nodes, in=4, hidden=32, out=8, num_layers=3.
    N, IN_C, HID_C, OUT_C, NUM_LAYERS = 16, 4, 32, 8, 3

    key, kx, ka, kp = jax.random.split(key, 4)
    x = jax.random.normal(kx, (N, IN_C), jnp.float32)
    # Random symmetric 0/1 adjacency (no self loops; GINConv adds the self term).
    a = (jax.random.uniform(ka, (N, N)) < 0.3).astype(jnp.float32)
    adj = jnp.maximum(a, a.T) * (1.0 - jnp.eye(N, dtype=jnp.float32))

    linears, bns = init_gin_params(kp, IN_C, HID_C, OUT_C, NUM_LAYERS)

    out = gin_forward(x, adj, linears, bns)
    out = jax.block_until_ready(out)

    ref = gin_forward_ref(x, adj, linears, bns)
    assert out.shape == (N, OUT_C)
    assert jnp.allclose(out, ref, atol=5e-2, rtol=5e-2), (
        float(jnp.max(jnp.abs(out - ref))))

    print("KERNEL_OK")
</pallas_src>

<mosaic_0001>
module attributes {stable_mosaic.version = 11 : i64} {
  func.func @_gin_layer_kernel(%arg0: i32, %arg1: i32, %arg2: memref<128x128xbf16, #tpu.memory_space<vmem>>, %arg3: memref<128x128xf32, #tpu.memory_space<vmem>>, %arg4: memref<128x128xf32, #tpu.memory_space<vmem>>, %arg5: memref<1x128xf32, #tpu.memory_space<vmem>>, %arg6: memref<1x128xf32, #tpu.memory_space<vmem>>, %arg7: memref<1x128xf32, #tpu.memory_space<vmem>>, %arg8: memref<128x128xf32, #tpu.memory_space<vmem>>, %arg9: memref<128x128xf32, #tpu.memory_space<vmem>>) attributes {dimension_semantics = [#tpu.dimension_semantics<parallel>, #tpu.dimension_semantics<arbitrary>], iteration_bounds = array<i64: 1, 1>, scalar_prefetch = 0 : i64, scratch_operands = 1 : i64, tpu.core_type = #tpu.core_type<tc>, window_params = [{transform_indices = @transform_0, window_bounds = array<i64: 128, 128>}, {transform_indices = @transform_1, window_bounds = array<i64: 128, 128>}, {pipeline_mode = #tpu.pipeline_mode<synchronous>, transform_indices = @transform_2, window_bounds = array<i64: 128, 128>}, {pipeline_mode = #tpu.pipeline_mode<synchronous>, transform_indices = @transform_3, window_bounds = array<i64: 1, 128>}, {pipeline_mode = #tpu.pipeline_mode<synchronous>, transform_indices = @transform_4, window_bounds = array<i64: 1, 128>}, {pipeline_mode = #tpu.pipeline_mode<synchronous>, transform_indices = @transform_5, window_bounds = array<i64: 1, 128>}, {transform_indices = @transform_6, window_bounds = array<i64: 128, 128>}]} {
    %c0_i32 = arith.constant 0 : i32
    %0 = arith.cmpi eq, %arg1, %c0_i32 : i32
    %1 = arith.extui %0 : i1 to i32
    %c0_i32_0 = arith.constant 0 : i32
    %2 = arith.cmpi ne, %1, %c0_i32_0 : i32
    scf.if %2 {
      %cst_10 = arith.constant 0.000000e+00 : f32
      %13 = vector.broadcast %cst_10 : f32 to vector<128x128xf32>
      %c0_11 = arith.constant 0 : index
      %c0_12 = arith.constant 0 : index
      %14 = vector.load %arg9[%c0_11, %c0_12] : memref<128x128xf32, #tpu.memory_space<vmem>>, vector<128x128xf32>
      tpu.vector_store %arg9[%c0_11, %c0_12], %13 {strides = array<i32>} : memref<128x128xf32, #tpu.memory_space<vmem>>, vector<128x128xf32>,
    } else {
    }
    %c0 = arith.constant 0 : index
    %c0_1 = arith.constant 0 : index
    %3 = vector.load %arg9[%c0, %c0_1] : memref<128x128xf32, #tpu.memory_space<vmem>>, vector<128x128xf32>
    %c0_2 = arith.constant 0 : index
    %c0_3 = arith.constant 0 : index
    %4 = vector.load %arg2[%c0_2, %c0_3] : memref<128x128xbf16, #tpu.memory_space<vmem>>, vector<128x128xbf16>
    %5 = arith.extf %4 : vector<128x128xbf16> to vector<128x128xf32>
    %c0_4 = arith.constant 0 : index
    %c0_5 = arith.constant 0 : index
    %6 = vector.load %arg3[%c0_4, %c0_5] : memref<128x128xf32, #tpu.memory_space<vmem>>, vector<128x128xf32>
    %cst = arith.constant dense<0.000000e+00> : vector<128x128xf32>
    %7 = tpu.matmul %5, %6, %cst {dimension_numbers = #tpu.dot_dimension_numbers<[1], [0], [0], [1], [0, 0, 1, 1], [], []>} : vector<128x128xf32>, vector<128x128xf32>, vector<128x128xf32> -> vector<128x128xf32>
    %8 = arith.addf %3, %7 : vector<128x128xf32>
    %c0_6 = arith.constant 0 : index
    %c0_7 = arith.constant 0 : index
    %9 = vector.load %arg9[%c0_6, %c0_7] : memref<128x128xf32, #tpu.memory_space<vmem>>, vector<128x128xf32>
    tpu.vector_store %arg9[%c0_6, %c0_7], %8 {strides = array<i32>} : memref<128x128xf32, #tpu.memory_space<vmem>>, vector<128x128xf32>,
    %c0_i32_8 = arith.constant 0 : i32
    %10 = arith.cmpi eq, %arg1, %c0_i32_8 : i32
    %11 = arith.extui %10 : i1 to i32
    %c0_i32_9 = arith.constant 0 : i32
    %12 = arith.cmpi ne, %11, %c0_i32_9 : i32
    scf.if %12 {
      %c0_10 = arith.constant 0 : index
      %c0_11 = arith.constant 0 : index
      %13 = vector.load %arg9[%c0_10, %c0_11] : memref<128x128xf32, #tpu.memory_space<vmem>>, vector<128x128xf32>
      %c0_12 = arith.constant 0 : index
      %c0_13 = arith.constant 0 : index
      %14 = vector.load %arg4[%c0_12, %c0_13] : memref<128x128xf32, #tpu.memory_space<vmem>>, vector<128x128xf32>
      %cst_14 = arith.constant dense<0.000000e+00> : vector<128x128xf32>
      %15 = tpu.matmul %13, %14, %cst_14 {dimension_numbers = #tpu.dot_dimension_numbers<[1], [0], [0], [1], [0, 0, 1, 1], [], []>} : vector<128x128xf32>, vector<128x128xf32>, vector<128x128xf32> -> vector<128x128xf32>
      %c0_15 = arith.constant 0 : index
      %c0_16 = arith.constant 0 : index
      %16 = vector.load %arg5[%c0_15, %c0_16] : memref<1x128xf32, #tpu.memory_space<vmem>>, vector<1x128xf32>
      %17 = vector.broadcast %16 : vector<1x128xf32> to vector<128x128xf32>
      %18 = arith.addf %15, %17 : vector<128x128xf32>
      %c0_17 = arith.constant 0 : index
      %c0_18 = arith.constant 0 : index
      %19 = vector.load %arg6[%c0_17, %c0_18] : memref<1x128xf32, #tpu.memory_space<vmem>>, vector<1x128xf32>
      %20 = vector.broadcast %19 : vector<1x128xf32> to vector<128x128xf32>
      %21 = arith.mulf %18, %20 : vector<128x128xf32>
      %c0_19 = arith.constant 0 : index
      %c0_20 = arith.constant 0 : index
      %22 = vector.load %arg7[%c0_19, %c0_20] : memref<1x128xf32, #tpu.memory_space<vmem>>, vector<1x128xf32>
      %23 = vector.broadcast %22 : vector<1x128xf32> to vector<128x128xf32>
      %24 = arith.addf %21, %23 : vector<128x128xf32>
      %cst_21 = arith.constant 0.000000e+00 : f32
      %25 = vector.broadcast %cst_21 : f32 to vector<128x128xf32>
      %26 = arith.maximumf %24, %25 : vector<128x128xf32>
      %c0_22 = arith.constant 0 : index
      %c0_23 = arith.constant 0 : index
      %27 = vector.load %arg8[%c0_22, %c0_23] : memref<128x128xf32, #tpu.memory_space<vmem>>, vector<128x128xf32>
      tpu.vector_store %arg8[%c0_22, %c0_23], %26 {strides = array<i32>} : memref<128x128xf32, #tpu.memory_space<vmem>>, vector<128x128xf32>,
    } else {
    }
    return
  }
  func.func @transform_0(%arg0: i32, %arg1: i32) -> (i32, i32) {
    %c0_i32 = arith.constant 0 : i32
    return %arg0, %arg1 : i32, i32
  }
  func.func @transform_1(%arg0: i32, %arg1: i32) -> (i32, i32) {
    %c0_i32 = arith.constant 0 : i32
    %c0_i32_0 = arith.constant 0 : i32
    return %arg1, %c0_i32 : i32, i32
  }
  func.func @transform_2(%arg0: i32, %arg1: i32) -> (i32, i32) {
    %c0_i32 = arith.constant 0 : i32
    %c0_i32_0 = arith.constant 0 : i32
    %c0_i32_1 = arith.constant 0 : i32
    return %c0_i32, %c0_i32_0 : i32, i32
  }
  func.func @transform_3(%arg0: i32, %arg1: i32) -> (i32, i32) {
    %c0_i32 = arith.constant 0 : i32
    %c0_i32_0 = arith.constant 0 : i32
    %c0_i32_1 = arith.constant 0 : i32
    return %c0_i32, %c0_i32_0 : i32, i32
  }
  func.func @transform_4(%arg0: i32, %arg1: i32) -> (i32, i32) {
    %c0_i32 = arith.constant 0 : i32
    %c0_i32_0 = arith.constant 0 : i32
    %c0_i32_1 = arith.constant 0 : i32
    return %c0_i32, %c0_i32_0 : i32, i32
  }
  func.func @transform_5(%arg0: i32, %arg1: i32) -> (i32, i32) {
    %c0_i32 = arith.constant 0 : i32
    %c0_i32_0 = arith.constant 0 : i32
    %c0_i32_1 = arith.constant 0 : i32
    return %c0_i32, %c0_i32_0 : i32, i32
  }
  func.func @transform_6(%arg0: i32, %arg1: i32) -> (i32, i32) {
    %c0_i32 = arith.constant 0 : i32
    %c0_i32_0 = arith.constant 0 : i32
    return %arg0, %c0_i32 : i32, i32
  }
}

</mosaic_0001>

<bundles_post_ra>
// kernel: tpu_custom_call.1
= control target key start
LH: loop header
LB: loop body
LE: loop exit
PB: predicated region body
PF: predicated region fallthrough
CT: control target
= control target key end

     0   :  { %11 = vsyncpa [#allocation4], 0  ;;  %s1160_s0 = inlined_call_operand.hbm [shape: bf16[128,128], index: 0, kind: input, shape index: {}]   ;;  %s1161_s1 = inlined_call_operand.hbm [shape: f32[128,128], index: 1, kind: input, shape index: {}]   ;;  %s1162_s2 = inlined_call_operand.hbm [shape: f32[128,128], index: 2, kind: input, shape index: {}]   ;;  %s1163_s3 = inlined_call_operand.vmem [shape: f32[1,128], index: 3, kind: input, shape index: {}]   ;;  %s1164_s4 = inlined_call_operand.vmem [shape: f32[1,128], index: 4, kind: input, shape index: {}]   ;;  %s1165_s5 = inlined_call_operand.vmem [shape: f32[1,128], index: 5, kind: input, shape index: {}]   ;;  %s1166_s6 = inlined_call_operand.hbm [shape: f32[128,128], index: 6, kind: output, shape index: {}]  }
   0x1   :  { %12 = vsyncpa [#allocation7], 0 }
   0x2   :  { %13 = vsyncpa [#allocation5], 0  ;;  %s993_s21 = smov [#allocation6]   ;;  %s899_s25 = scalar_lea.hbm %s1161_s1, 2048 }
   0x3   :  { %s31_s22 = sshll.u32 %s993_s21, 4  ;;  %p900_p0 = scmp.ne.s32.totalorder %s1161_s1, %s899_s25  ;;  %s32_s22 = int_to_ptr.vmem [resolvable:$true] %s31_s22 }
   0x4   :  { %p903_p1 = scmp.lt.u32.totalorder %s899_s25, %s1161_s1 }
   0x6   :  { %p905_p2 = pnand %p903_p1, %p900_p0 }
   0x8   :  { %908 = shalt.err (!%p905_p2)
}
   0x9   :  { %s909_s30 = scalar_lea.vmem %s32_s22, 2048  ;;  %p914_p4 = scmp.lt.s32.totalorder %s32_s22, %s32_s22 }
   0xa   :  { %p910_p3 = scmp.ne.s32.totalorder %s32_s22, %s909_s30  ;;  %p915_p5 = scmp.lt.s32.totalorder %s909_s30, %s909_s30 }
   0xc   :  { %p916_p6 = por %p915_p5, %p914_p4 }
   0xe   :  { %p917_p7 = pnand %p916_p6, %p910_p3 }
  0x10   :  { %920 = shalt.err (!%p917_p7)
}
  0x11   :  { %s994_s7 = smov 128   ;;  %s995_s8 = smov 8  }
  0x12   :  { %37 = dma.hbm_to_vmem [thread:$0]  %s1161_s1, 2048, %s32_s22, [#allocation7], %s994_s7, %s994_s7, %s995_s8  }
  0x13   :  { %s996_s11 = smov [#allocation3]   ;;  %s921_s15 = scalar_lea.hbm %s1160_s0, 1024 }
  0x14   :  { %s19_s12 = sshll.u32 %s996_s11, 4  ;;  %p922_p8 = scmp.ne.s32.totalorder %s1160_s0, %s921_s15  ;;  %s20_s12 = int_to_ptr.vmem [resolvable:$true] %s19_s12 }
  0x15   :  { %p925_p9 = scmp.lt.u32.totalorder %s921_s15, %s1160_s0 }
  0x17   :  { %p927_p10 = pnand %p925_p9, %p922_p8 }
  0x19   :  { %930 = shalt.err (!%p927_p10)
}
  0x1a   :  { %s931_s20 = scalar_lea.vmem %s20_s12, 1024  ;;  %p936_p12 = scmp.lt.s32.totalorder %s20_s12, %s20_s12 }
  0x1b   :  { %p932_p11 = scmp.ne.s32.totalorder %s20_s12, %s931_s20  ;;  %p937_p13 = scmp.lt.s32.totalorder %s931_s20, %s931_s20 }
  0x1d   :  { %p938_p0 = por %p937_p13, %p936_p12 }
  0x1f   :  { %p939_p1 = pnand %p938_p0, %p932_p11 }
  0x21   :  { %942 = shalt.err (!%p939_p1)
}
  0x22   :  { %s997_s1 = smov 64   ;;  %s998_s21 = smov 4  }
  0x23   :  { %25 = dma.hbm_to_vmem [thread:$0]  %s1160_s0, 1024, %s20_s12, [#allocation4], %s997_s1, %s997_s1, %s998_s21  }
  0x24   :  { %s999_s24 = smov [#allocation8]   ;;  %s943_s28 = scalar_lea.hbm %s1162_s2, 2048 }
  0x25   :  { %s43_s25 = sshll.u32 %s999_s24, 4  ;;  %p944_p2 = scmp.ne.s32.totalorder %s1162_s2, %s943_s28  ;;  %s44_s25 = int_to_ptr.vmem [resolvable:$true] %s43_s25 }
  0x26   :  { %p947_p3 = scmp.lt.u32.totalorder %s943_s28, %s1162_s2 }
  0x28   :  { %p949_p4 = pnand %p947_p3, %p944_p2 }
  0x2a   :  { %952 = shalt.err (!%p949_p4)
}
  0x2b   :  { %s953_s11 = scalar_lea.vmem %s44_s25, 2048  ;;  %p958_p6 = scmp.lt.s32.totalorder %s44_s25, %s44_s25 }
  0x2c   :  { %p954_p5 = scmp.ne.s32.totalorder %s44_s25, %s953_s11  ;;  %p959_p7 = scmp.lt.s32.totalorder %s953_s11, %s953_s11 }
  0x2e   :  { %p960_p8 = por %p959_p7, %p958_p6 }
  0x30   :  { %p961_p9 = pnand %p960_p8, %p954_p5 }
  0x32   :  { %964 = shalt.err (!%p961_p9)
}
  0x33   :  { %49 = dma.hbm_to_vmem [thread:$0]  %s1162_s2, 2048, %s44_s25, [#allocation7], %s994_s7, %s994_s7, %s995_s8  }
  0x34   :  { %987 = dma.done.wait [#allocation4], 1024  }
  0x35   :  { %988 = vsyncadd [#allocation4], 4294966272 }
  0x36   :  { %989 = dma.done.wait [#allocation7], 4096  }
  0x37   :  { %990 = vsyncadd [#allocation7], 4294963200  ;;  %v133_v0 = vld [vmem:[#allocation6] sm:$0xff]  ;;  %v134_v1 = vld [vmem:[#allocation6 + $0x8] sm:$0xff] }
  0x38   :  { %v135_v2 = vld [vmem:[#allocation6 + $0x10] sm:$0xff]  ;;  %v827_v3 = vpack.c.bf16 %v134_v1, %v133_v0  ;;  %v136_v4 = vld [vmem:[#allocation6 + $0x18] sm:$0xff]  ;;  %v137_v6 = vld [vmem:[#allocation6 + $0x20] sm:$0xff] }
  0x39   :  { %v831_v5 = vpack.c.bf16 %v136_v4, %v135_v2  ;;  %v138_v7 = vld [vmem:[#allocation6 + $0x28] sm:$0xff]  ;;  %v1078_v9 = vld [vmem:[#allocation3] sm:$0xff]   ;;  %v139_v10 = vld [vmem:[#allocation6 + $0x30] sm:$0xff] }
  0x3a   :  { %828 = vmatprep.subr.bf16.mxu0 %v827_v3  ;;  %v835_v8 = vpack.c.bf16 %v138_v7, %v137_v6  ;;  %v140_v11 = vld [vmem:[#allocation6 + $0x38] sm:$0xff]  ;;  %v614_v12 = vunpack.c.l.bf16 %v1078_v9  ;;  %v345_v13 = vld [vmem:[#allocation8] sm:$0xff]  ;;  %v346_v14 = vld [vmem:[#allocation8 + $0x8] sm:$0xff]  ;;  %v615_v48 = vunpack.c.h.bf16 %v1078_v9 }
  0x3b   :  { %830 = vmatpush3.bf16.msra.mxu0 %v827_v3  ;;  %v347_v15 = vld [vmem:[#allocation8 + $0x10] sm:$0xff]  ;;  %v839_v16 = vpack.c.bf16 %v140_v11, %v139_v10  ;;  %v348_v17 = vld [vmem:[#allocation8 + $0x18] sm:$0xff]  ;;  %v141_v18 = vld [vmem:[#allocation6 + $0x40] sm:$0xff]  ;;  %v859_v20 = vpack.c.bf16 %v346_v14, %v345_v13 }
  0x3c   :  { %832 = vmatprep.subr.bf16.mxu0 %v831_v5  ;;  %747 = vmatprep.mubr.f32.mxu0 %v614_v12  ;;  %v142_v19 = vld [vmem:[#allocation6 + $0x48] sm:$0xff]  ;;  %v863_v21 = vpack.c.bf16 %v348_v17, %v347_v15  ;;  %v349_v22 = vld [vmem:[#allocation8 + $0x20] sm:$0xff]  ;;  %v143_v25 = vld [vmem:[#allocation6 + $0x50] sm:$0xff] }
  0x3d   :  { %v350_v23 = vld [vmem:[#allocation8 + $0x28] sm:$0xff]  ;;  %860 = vmatprep.subr.bf16.mxu1 %v859_v20  ;;  %v843_v24 = vpack.c.bf16 %v142_v19, %v141_v18  ;;  %v144_v26 = vld [vmem:[#allocation6 + $0x58] sm:$0xff]  ;;  %v351_v28 = vld [vmem:[#allocation8 + $0x30] sm:$0xff] }
  0x3e   :  { %862 = vmatpush3.bf16.msra.mxu1 %v859_v20  ;;  %v867_v27 = vpack.c.bf16 %v350_v23, %v349_v22  ;;  %v352_v29 = vld [vmem:[#allocation8 + $0x38] sm:$0xff]  ;;  %v847_v30 = vpack.c.bf16 %v144_v26, %v143_v25  ;;  %v145_v31 = vld [vmem:[#allocation6 + $0x60] sm:$0xff]  ;;  %v146_v32 = vld [vmem:[#allocation6 + $0x68] sm:$0xff] }
  0x3f   :  { %834 = vmatpush3.bf16.msra.mxu0 %v831_v5  ;;  %864 = vmatprep.subr.bf16.mxu1 %v863_v21  ;;  %v871_v33 = vpack.c.bf16 %v352_v29, %v351_v28  ;;  %v353_v34 = vld [vmem:[#allocation8 + $0x40] sm:$0xff]  ;;  %v354_v35 = vld [vmem:[#allocation8 + $0x48] sm:$0xff]  ;;  %v851_v36 = vpack.c.bf16 %v146_v32, %v145_v31  ;;  %v147_v37 = vld [vmem:[#allocation6 + $0x70] sm:$0xff] }
  0x40   :  { %836 = vmatprep.subr.bf16.mxu0 %v835_v8  ;;  %v148_v38 = vld [vmem:[#allocation6 + $0x78] sm:$0xff]  ;;  %v875_v39 = vpack.c.bf16 %v354_v35, %v353_v34  ;;  %v355_v40 = vld [vmem:[#allocation8 + $0x50] sm:$0xff]  ;;  %v357_v44 = vld [vmem:[#allocation8 + $0x60] sm:$0xff] }
  0x41   :  { %v356_v41 = vld [vmem:[#allocation8 + $0x58] sm:$0xff]  ;;  %v855_v42 = vpack.c.bf16 %v148_v38, %v147_v37  ;;  %v358_v45 = vld [vmem:[#allocation8 + $0x68] sm:$0xff]  ;;  %v359_v49 = vld [vmem:[#allocation8 + $0x70] sm:$0xff] }
  0x42   :  { %866 = vmatpush3.bf16.msra.mxu1 %v863_v21  ;;  %v879_v43 = vpack.c.bf16 %v356_v41, %v355_v40  ;;  %v644_v46 = vld [vmem:[#allocation3 + $0x8] sm:$0xff]   ;;  %v883_v47 = vpack.c.bf16 %v358_v45, %v357_v44  ;;  %v360_v50 = vld [vmem:[#allocation8 + $0x78] sm:$0xff]  ;;  %v645_v52 = vld [vmem:[#allocation3 + $0x10] sm:$0xff]  }
  0x43   :  { %838 = vmatpush3.bf16.msra.mxu0 %v835_v8  ;;  %868 = vmatprep.subr.bf16.mxu1 %v867_v27  ;;  %v618_v51 = vunpack.c.l.bf16 %v644_v46  ;;  %v887_v53 = vpack.c.bf16 %v360_v50, %v359_v49  ;;  %v619_v54 = vunpack.c.h.bf16 %v644_v46  ;;  %v622_v55 = vunpack.c.l.bf16 %v645_v52  ;;  %v646_v56 = vld [vmem:[#allocation3 + $0x18] sm:$0xff]   ;;  %v647_v59 = vld [vmem:[#allocation3 + $0x20] sm:$0xff]   ;;  %v648_v62 = vld [vmem:[#allocation3 + $0x28] sm:$0xff]  }
  0x44   :  { %840 = vmatprep.subr.bf16.mxu0 %v839_v16  ;;  %v623_v57 = vunpack.c.h.bf16 %v645_v52  ;;  %v626_v58 = vunpack.c.l.bf16 %v646_v56  ;;  %v627_v60 = vunpack.c.h.bf16 %v646_v56  ;;  %v630_v61 = vunpack.c.l.bf16 %v647_v59  ;;  %v649_v1 = vld [vmem:[#allocation3 + $0x30] sm:$0xff]   ;;  %v650_v4 = vld [vmem:[#allocation3 + $0x38] sm:$0xff]   ;;  %v1090_v26 = vld [vmem:[%s1164_s4] ss:$0 sm:$0xff] }
  0x45   :  { %v631_v63 = vunpack.c.h.bf16 %v647_v59  ;;  %v634_v0 = vunpack.c.l.bf16 %v648_v62  ;;  %v635_v2 = vunpack.c.h.bf16 %v648_v62  ;;  %v638_v3 = vunpack.c.l.bf16 %v649_v1  ;;  %v1096_v29 = vld [vmem:[%s1165_s5] ss:$0 sm:$0xff] }
  0x46   :  { %870 = vmatpush3.bf16.msra.mxu1 %v867_v27  ;;  %v639_v5 = vunpack.c.h.bf16 %v649_v1  ;;  %v642_v6 = vunpack.c.l.bf16 %v650_v4  ;;  %v643_v7 = vunpack.c.h.bf16 %v650_v4 }
  0x47   :  { %842 = vmatpush3.bf16.msra.mxu0 %v839_v16  ;;  %872 = vmatprep.subr.bf16.mxu1 %v871_v33 }
  0x48   :  { %844 = vmatprep.subr.bf16.mxu0 %v843_v24 }
  0x4a   :  { %874 = vmatpush3.bf16.msra.mxu1 %v871_v33 }
  0x4b   :  { %846 = vmatpush3.bf16.msra.mxu0 %v843_v24  ;;  %876 = vmatprep.subr.bf16.mxu1 %v875_v39  ;;  %v1085_v24 = vld [vmem:[%s1163_s3] ss:$0 sm:$0xff]  ;;  %s1000_s3 = smov [#allocation9]  }
  0x4c   :  { %848 = vmatprep.subr.bf16.mxu0 %v847_v30  ;;  %s596_s4 = sshll.u32 %s1000_s3, 4  ;;  %s597_s4 = int_to_ptr.vmem [resolvable:$true] %s596_s4 }
  0x4d   :  { %s965_s5 = scalar_lea.vmem %s597_s4, 2048  ;;  %p970_p11 = scmp.lt.s32.totalorder %s597_s4, %s597_s4 }
  0x4e   :  { %878 = vmatpush3.bf16.msra.mxu1 %v875_v39  ;;  %p966_p10 = scmp.ne.s32.totalorder %s597_s4, %s965_s5  ;;  %p971_p12 = scmp.lt.s32.totalorder %s965_s5, %s965_s5 }
  0x4f   :  { %850 = vmatpush3.bf16.msra.mxu0 %v847_v30  ;;  %880 = vmatprep.subr.bf16.mxu1 %v879_v43 }
  0x50   :  { %852 = vmatprep.subr.bf16.mxu0 %v851_v36  ;;  %p972_p13 = por %p971_p12, %p970_p11 }
  0x52   :  { %882 = vmatpush3.bf16.msra.mxu1 %v879_v43  ;;  %p973_p0 = pnand %p972_p13, %p966_p10 }
  0x53   :  { %854 = vmatpush3.bf16.msra.mxu0 %v851_v36  ;;  %884 = vmatprep.subr.bf16.mxu1 %v883_v47 }
  0x54   :  { %856 = vmatprep.subr.bf16.mxu0 %v855_v42 }
  0x56   :  { %886 = vmatpush3.bf16.msra.mxu1 %v883_v47 }
  0x57   :  { %858 = vmatpush3.bf16.msra.mxu0 %v855_v42  ;;  %888 = vmatprep.subr.bf16.mxu1 %v887_v53 }
  0x5a   :  { %748 = vmatmul.mubr.f32.vlgmr.msra.gmra.mrb[0].mxu0 %v615_v48  ;;  %890 = vmatpush3.bf16.msra.mxu1 %v887_v53 }
  0x5b   :  { %750 = vmatprep.mubr.f32.mxu0 %v618_v51 }
  0x5e   :  { %751 = vmatmul.mubr.f32.gmra.mrb[2].mxu0 %v619_v54 }
  0x5f   :  { %753 = vmatprep.mubr.f32.mxu0 %v622_v55 }
  0x62   :  { %754 = vmatmul.mubr.f32.gmra.mrb[4].mxu0 %v623_v57 }
  0x63   :  { %756 = vmatprep.mubr.f32.mxu0 %v626_v58 }
  0x66   :  { %757 = vmatmul.mubr.f32.gmra.mrb[6].mxu0 %v627_v60 }
  0x67   :  { %759 = vmatprep.mubr.f32.mxu0 %v630_v61 }
  0x6a   :  { %760 = vmatmul.mubr.f32.gmra.mrb[8].mxu0 %v631_v63 }
  0x6b   :  { %762 = vmatprep.mubr.f32.mxu0 %v634_v0 }
  0x6e   :  { %763 = vmatmul.mubr.f32.gmra.mrb[10].mxu0 %v635_v2 }
  0x6f   :  { %765 = vmatprep.mubr.f32.mxu0 %v638_v3 }
  0x72   :  { %766 = vmatmul.mubr.f32.gmra.mrb[12].mxu0 %v639_v5 }
  0x73   :  { %768 = vmatprep.mubr.f32.mxu0 %v642_v6 }
  0x76   :  { %769 = vmatmul.mubr.f32.gmra.mrb[14].mxu0 %v643_v7 }
 0x12d   :  { %v749_v8 = vpop.f32.mrb[0].mxu0 }
 0x12e   :  { %v215_v9 = vpop.f32.mrb[1].mxu0 }
 0x12f   :  { %803 = vmatprep.mubr.f32.mxu1 %v215_v9 }
 0x130   :  { %804 = vmatmul.mubr.f32.vlgmr.msra.gmra.mrb[0].mxu1 %v749_v8 }
 0x131   :  { %v752_v10 = vpop.f32.mrb[2].mxu0 }
 0x132   :  { %v225_v11 = vpop.f32.mrb[3].mxu0 }
 0x133   :  { %806 = vmatprep.mubr.f32.mxu1 %v225_v11 }
 0x134   :  { %807 = vmatmul.mubr.f32.gmra.mrb[2].mxu1 %v752_v10 }
 0x135   :  { %v755_v12 = vpop.f32.mrb[4].mxu0 }
 0x136   :  { %v235_v13 = vpop.f32.mrb[5].mxu0 }
 0x137   :  { %809 = vmatprep.mubr.f32.mxu1 %v235_v13 }
 0x138   :  { %810 = vmatmul.mubr.f32.gmra.mrb[4].mxu1 %v755_v12 }
 0x139   :  { %v758_v14 = vpop.f32.mrb[6].mxu0 }
 0x13a   :  { %v245_v15 = vpop.f32.mrb[7].mxu0 }
 0x13b   :  { %812 = vmatprep.mubr.f32.mxu1 %v245_v15 }
 0x13c   :  { %813 = vmatmul.mubr.f32.gmra.mrb[6].mxu1 %v758_v14 }
 0x13d   :  { %v761_v16 = vpop.f32.mrb[8].mxu0 }
 0x13e   :  { %v255_v17 = vpop.f32.mrb[9].mxu0 }
 0x13f   :  { %815 = vmatprep.mubr.f32.mxu1 %v255_v17 }
 0x140   :  { %816 = vmatmul.mubr.f32.gmra.mrb[8].mxu1 %v761_v16 }
 0x141   :  { %v764_v18 = vpop.f32.mrb[10].mxu0 }
 0x142   :  { %v265_v19 = vpop.f32.mrb[11].mxu0 }
 0x143   :  { %818 = vmatprep.mubr.f32.mxu1 %v265_v19 }
 0x144   :  { %819 = vmatmul.mubr.f32.gmra.mrb[10].mxu1 %v764_v18 }
 0x145   :  { %v767_v20 = vpop.f32.mrb[12].mxu0 }
 0x146   :  { %v275_v21 = vpop.f32.mrb[13].mxu0 }
 0x147   :  { %821 = vmatprep.mubr.f32.mxu1 %v275_v21 }
 0x148   :  { %822 = vmatmul.mubr.f32.gmra.mrb[12].mxu1 %v767_v20 }
 0x149   :  { %v770_v22 = vpop.f32.mrb[14].mxu0 }
 0x14a   :  { %v285_v23 = vpop.f32.mrb[15].mxu0 }
 0x14b   :  { %824 = vmatprep.mubr.f32.mxu1 %v285_v23 }
 0x14c   :  { %825 = vmatmul.mubr.f32.gmra.mrb[14].mxu1 %v770_v22 }
 0x203   :  { %v805_v25 = vpop.f32.mrb[0].mxu1 }
 0x204   :  { %v440_v27 = vadd.f32 %v805_v25, %v1085_v24  ;;  %v434_v28 = vpop.f32.mrb[1].mxu1 }
 0x205   :  { %v435_v30 = vadd.f32 %v1085_v24, %v434_v28 }
 0x206   :  { %v521_v31 = vmul.f32 %v1090_v26, %v440_v27 }
 0x207   :  { %v520_v32 = vmul.f32 %v1090_v26, %v435_v30  ;;  %v808_v33 = vpop.f32.mrb[2].mxu1 }
 0x208   :  { %v544_v34 = vadd.f32 %v1096_v29, %v521_v31  ;;  %v450_v35 = vadd.f32 %v808_v33, %v1085_v24  ;;  %v444_v36 = vpop.f32.mrb[3].mxu1 }
 0x209   :  { %v543_v37 = vadd.f32 %v1096_v29, %v520_v32  ;;  %v445_v38 = vadd.f32 %v1085_v24, %v444_v36 }
 0x20a   :  { %v560_v39 = vmax.f32 %v544_v34, 0.0  ;;  %v523_v40 = vmul.f32 %v1090_v26, %v450_v35 }
 0x20b   :  { %v559_v41 = vmax.f32 %v543_v37, 0.0  ;;  %v522_v42 = vmul.f32 %v1090_v26, %v445_v38  ;;  %v811_v43 = vpop.f32.mrb[4].mxu1 }
 0x20c   :  { %576 = vst [vmem:[#allocation9 + $0x8] sm:$0xff] %v560_v39  ;;  %v546_v44 = vadd.f32 %v1096_v29, %v523_v40  ;;  %v460_v45 = vadd.f32 %v811_v43, %v1085_v24  ;;  %v454_v46 = vpop.f32.mrb[5].mxu1 }
 0x20d   :  { %575 = vst [vmem:[#allocation9] sm:$0xff] %v559_v41  ;;  %v545_v47 = vadd.f32 %v1096_v29, %v522_v42  ;;  %v455_v48 = vadd.f32 %v1085_v24, %v454_v46 }
 0x20e   :  { %v562_v49 = vmax.f32 %v546_v44, 0.0  ;;  %v525_v50 = vmul.f32 %v1090_v26, %v460_v45 }
 0x20f   :  { %v561_v51 = vmax.f32 %v545_v47, 0.0  ;;  %v524_v52 = vmul.f32 %v1090_v26, %v455_v48  ;;  %v814_v53 = vpop.f32.mrb[6].mxu1 }
 0x210   :  { %578 = vst [vmem:[#allocation9 + $0x18] sm:$0xff] %v562_v49  ;;  %v548_v54 = vadd.f32 %v1096_v29, %v525_v50  ;;  %v470_v55 = vadd.f32 %v814_v53, %v1085_v24  ;;  %v464_v56 = vpop.f32.mrb[7].mxu1 }
 0x211   :  { %577 = vst [vmem:[#allocation9 + $0x10] sm:$0xff] %v561_v51  ;;  %v547_v57 = vadd.f32 %v1096_v29, %v524_v52  ;;  %v465_v58 = vadd.f32 %v1085_v24, %v464_v56 }
 0x212   :  { %v564_v59 = vmax.f32 %v548_v54, 0.0  ;;  %v527_v60 = vmul.f32 %v1090_v26, %v470_v55 }
 0x213   :  { %v563_v61 = vmax.f32 %v547_v57, 0.0  ;;  %v526_v62 = vmul.f32 %v1090_v26, %v465_v58  ;;  %v817_v63 = vpop.f32.mrb[8].mxu1 }
 0x214   :  { %580 = vst [vmem:[#allocation9 + $0x28] sm:$0xff] %v564_v59  ;;  %v550_v0 = vadd.f32 %v1096_v29, %v527_v60  ;;  %v480_v1 = vadd.f32 %v817_v63, %v1085_v24  ;;  %v474_v2 = vpop.f32.mrb[9].mxu1 }
 0x215   :  { %579 = vst [vmem:[#allocation9 + $0x20] sm:$0xff] %v563_v61  ;;  %v549_v3 = vadd.f32 %v1096_v29, %v526_v62  ;;  %v475_v4 = vadd.f32 %v1085_v24, %v474_v2 }
 0x216   :  { %v566_v5 = vmax.f32 %v550_v0, 0.0  ;;  %v529_v6 = vmul.f32 %v1090_v26, %v480_v1 }
 0x217   :  { %v565_v7 = vmax.f32 %v549_v3, 0.0  ;;  %v528_v8 = vmul.f32 %v1090_v26, %v475_v4  ;;  %v820_v9 = vpop.f32.mrb[10].mxu1 }
 0x218   :  { %582 = vst [vmem:[#allocation9 + $0x38] sm:$0xff] %v566_v5  ;;  %v552_v10 = vadd.f32 %v1096_v29, %v529_v6  ;;  %v490_v11 = vadd.f32 %v820_v9, %v1085_v24  ;;  %v484_v12 = vpop.f32.mrb[11].mxu1 }
 0x219   :  { %581 = vst [vmem:[#allocation9 + $0x30] sm:$0xff] %v565_v7  ;;  %v551_v13 = vadd.f32 %v1096_v29, %v528_v8  ;;  %v485_v14 = vadd.f32 %v1085_v24, %v484_v12 }
 0x21a   :  { %v568_v15 = vmax.f32 %v552_v10, 0.0  ;;  %v531_v16 = vmul.f32 %v1090_v26, %v490_v11 }
 0x21b   :  { %v567_v17 = vmax.f32 %v551_v13, 0.0  ;;  %v530_v18 = vmul.f32 %v1090_v26, %v485_v14  ;;  %v823_v19 = vpop.f32.mrb[12].mxu1 }
 0x21c   :  { %584 = vst [vmem:[#allocation9 + $0x48] sm:$0xff] %v568_v15  ;;  %v554_v20 = vadd.f32 %v1096_v29, %v531_v16  ;;  %v500_v21 = vadd.f32 %v823_v19, %v1085_v24  ;;  %v494_v22 = vpop.f32.mrb[13].mxu1 }
 0x21d   :  { %583 = vst [vmem:[#allocation9 + $0x40] sm:$0xff] %v567_v17  ;;  %v553_v23 = vadd.f32 %v1096_v29, %v530_v18  ;;  %v495_v25 = vadd.f32 %v1085_v24, %v494_v22 }
 0x21e   :  { %v570_v27 = vmax.f32 %v554_v20, 0.0  ;;  %v533_v28 = vmul.f32 %v1090_v26, %v500_v21 }
 0x21f   :  { %v569_v30 = vmax.f32 %v553_v23, 0.0  ;;  %v532_v31 = vmul.f32 %v1090_v26, %v495_v25  ;;  %v826_v32 = vpop.f32.mrb[14].mxu1 }
 0x220   :  { %586 = vst [vmem:[#allocation9 + $0x58] sm:$0xff] %v570_v27  ;;  %v556_v33 = vadd.f32 %v1096_v29, %v533_v28  ;;  %v510_v34 = vadd.f32 %v826_v32, %v1085_v24  ;;  %v504_v35 = vpop.f32.mrb[15].mxu1 }
 0x221   :  { %585 = vst [vmem:[#allocation9 + $0x50] sm:$0xff] %v569_v30  ;;  %v555_v36 = vadd.f32 %v1096_v29, %v532_v31  ;;  %v505_v37 = vadd.f32 %v1085_v24, %v504_v35 }
 0x222   :  { %v572_v38 = vmax.f32 %v556_v33, 0.0  ;;  %v535_v39 = vmul.f32 %v1090_v26, %v510_v34 }
 0x223   :  { %v571_v40 = vmax.f32 %v555_v36, 0.0  ;;  %v534_v41 = vmul.f32 %v1090_v26, %v505_v37 }
 0x224   :  { %588 = vst [vmem:[#allocation9 + $0x68] sm:$0xff] %v572_v38  ;;  %v558_v42 = vadd.f32 %v1096_v29, %v535_v39 }
 0x225   :  { %587 = vst [vmem:[#allocation9 + $0x60] sm:$0xff] %v571_v40  ;;  %v557_v43 = vadd.f32 %v1096_v29, %v534_v41 }
 0x226   :  { %v574_v44 = vmax.f32 %v558_v42, 0.0 }
 0x227   :  { %v573_v45 = vmax.f32 %v557_v43, 0.0 }
 0x228   :  { %590 = vst [vmem:[#allocation9 + $0x78] sm:$0xff] %v574_v44 }
 0x229   :  { %589 = vst [vmem:[#allocation9 + $0x70] sm:$0xff] %v573_v45 }
 0x22a   :  { %976 = shalt.err (!%p973_p0)
}
 0x22b   :  { %s977_s20 = scalar_lea.hbm %s1166_s6, 2048 }
 0x22c   :  { %p978_p1 = scmp.ne.s32.totalorder %s1166_s6, %s977_s20  ;;  %p981_p2 = scmp.lt.u32.totalorder %s977_s20, %s1166_s6 }
 0x22e   :  { %p983_p3 = pnand %p981_p2, %p978_p1 }
 0x230   :  { %986 = shalt.err (!%p983_p3)
}
 0x231   :  { %602 = dma.vmem_to_hbm [thread:$0]  %s597_s4, 2048, %s1166_s6, [#allocation5], %s994_s7, %s994_s7, %s995_s8  }
 0x232   :  { %991 = dma.done.wait [#allocation5], 2048  }
 0x233   :  { %992 = vsyncadd [#allocation5], 4294965248 }
 0x234   :  { %606 = vsyncpa [#allocation4], 1 }
 0x235   :  { %607 = vsyncpa [#allocation7], 1 }
 0x236   :  { %608 = vsyncpa [#allocation5], 1 }

</bundles_post_ra>
